<compile_context>
chip_gen: v7x
topology: tpu7x:2x2x1
jax: 0.10.0
libtpu: 0.0.40
codegen_flags: <defaults>
</compile_context>

<pallas_src>
import functools

import numpy as np
import jax
import jax.numpy as jnp
from jax import lax
from jax.experimental import pallas as pl
from jax.experimental.pallas import tpu as pltpu

NEG_INF = float(np.finfo(np.float32).min)
BN_EPS = 1e-5


def _pick_col_tile(L, max_tile=512):
    """Largest column-tile <= max_tile that divides L and is sublane aligned."""
    if L <= max_tile:
        return L
    for t in range(max_tile, 7, -1):
        if L % t == 0 and t % 8 == 0:
            return t
    # TODO(synk): L with no sublane-aligned divisor <= max_tile falls back to one
    #             full-width tile (materializes an (L, L) logits tile per step).
    return L


def _bcc_direction_kernel(qin_ref, kin_ref, rw_ref, cm_ref,
                          wq_ref, bq_ref, wk_ref, bk_ref, h_ref,
                          out_ref, kb_mm_ref, kb_cm_ref,
                          *, tcol, num_tiles, mm_dtype):
    """One (batch, direction) grid step: raw (un-normalized) pooled features."""
    K = wq_ref.shape[1]

    q_in = qin_ref[0, 0]                    # (L, H)  mm_dtype   query-side sequence
    k_in = kin_ref[0, 0]                    # (L, H)  mm_dtype   key-side sequence
    rw = rw_ref[0, 0]                       # (1, L)  f32        mask of query-side rows
    cm = cm_ref[0, 0]                       # (L, 1)  f32        mask of key-side rows

    # FCNet (eval mode): weight-normed Linear (folded into W outside) + ReLU.
    qa = jnp.maximum(jnp.dot(q_in, wq_ref[...],
                             preferred_element_type=jnp.float32) + bq_ref[...], 0.0)
    kb = jnp.maximum(jnp.dot(k_in, wk_ref[...],
                             preferred_element_type=jnp.float32) + bk_ref[...], 0.0)

    qa_h = (qa * h_ref[...]).astype(mm_dtype)     # (L, K) bilinear LHS, h_mat folded in
    kb_mm_ref[...] = kb.astype(mm_dtype)          # S-matmul RHS (unmasked), sliced per tile
    kb_cm_ref[...] = kb * cm                      # GEMV RHS with key-side mask folded in

    # [row-weights ; ones]: one small f32 matmul per tile yields both the masked
    # softmax numerator and the denominator.
    rw_ones = jnp.concatenate([rw, jnp.ones_like(rw)], axis=0)    # (2, L)

    dims = (((1,), (1,)), ((), ()))

    def tile_body(t, acc):
        q0 = pl.multiple_of(t * tcol, tcol)
        kb_t = kb_mm_ref[pl.ds(q0, tcol), :]                      # (tcol, K)
        s = lax.dot_general(qa_h, kb_t, dims,
                            preferred_element_type=jnp.float32)   # (L, tcol) logits tile
        # Masked softmax over the row axis collapsed with the masked mean-pool:
        #   w[q] = cm[q] * sum_v rw[v] * softmax_v(S[:, q])
        # The where(mask>0, ., float32.min) fill of the original is dropped: the mask
        # is constant along the softmax axis, so it never alters surviving columns and
        # fully-masked columns are zeroed by cm.  h_bias cancels (constant shift).
        e = jnp.exp(s - jnp.max(s, axis=0, keepdims=True))        # (L, tcol) f32
        nd = jnp.dot(rw_ones, e, preferred_element_type=jnp.float32)  # (2, tcol)
        # Exact reciprocal: after the pooling rewrite only L denominators remain per
        # step, so the approx EUP path buys nothing and exact keeps validation tight.
        w = nd[0:1] * pl.reciprocal(nd[1:2], approx=False)        # (1, tcol)
        kbm_t = kb_cm_ref[pl.ds(q0, tcol), :]                     # (tcol, K) f32
        return acc + jnp.dot(w, kbm_t, preferred_element_type=jnp.float32)

    pooled = lax.fori_loop(0, num_tiles, tile_body,
                           jnp.zeros((1, K), jnp.float32))
    # Raw sum over positions; the 1/L mean factor and BatchNorm are folded into a
    # scale/shift epilogue in the wrapper.
    out_ref[0, 0] = pooled


def bcc_forward(X, Y, mask1, mask2, p, *, mm_dtype=jnp.bfloat16, max_col_tile=512):
    B, L, H = X.shape
    K = p["wq"].shape[1]
    tcol = _pick_col_tile(L, max_col_tile)
    num_tiles = L // tcol
    assert num_tiles * tcol == L

    xy = jnp.stack([X, Y]).astype(mm_dtype)                   # (2, B, L, H)
    m = jnp.stack([mask1, mask2]).astype(jnp.float32)         # (2, B, L)
    m_row = m.reshape(2, B, 1, L)     # lane-packed rows: softmax row weights
    m_col = m.reshape(2, B, L, 1)     # column layout: key-side pooling mask

    wq = p["wq"].astype(mm_dtype)
    wk = p["wk"].astype(mm_dtype)

    kernel = functools.partial(_bcc_direction_kernel, tcol=tcol,
                               num_tiles=num_tiles, mm_dtype=mm_dtype)

    def q_side(shape):   # grid step (b, d): pick stacked element d
        return pl.BlockSpec(shape, lambda b, d: (d, b) + (0,) * (len(shape) - 2))

    def k_side(shape):   # grid step (b, d): pick stacked element 1 - d
        return pl.BlockSpec(shape, lambda b, d: (1 - d, b) + (0,) * (len(shape) - 2))

    def shared(shape):
        return pl.BlockSpec(shape, lambda b, d: (0,) * len(shape))

    wbytes = wq.dtype.itemsize
    flops = 2 * B * (4 * L * H * K + 2 * L * L * K + 4 * L * L + 2 * L * K)
    bytes_accessed = (2 * xy.size * xy.dtype.itemsize        # read as q-side and k-side
                      + m_row.size * 4 + m_col.size * 4
                      + 2 * (H * K * wbytes + K * 4) + K * 4
                      + B * 2 * K * 4)
    cost = pl.CostEstimate(flops=int(flops),
                           transcendentals=int(2 * B * L * L),
                           bytes_accessed=int(bytes_accessed))

    pooled = pl.pallas_call(
        kernel,
        grid=(B, 2),
        in_specs=[
            q_side((1, 1, L, H)),        # query-side sequence (X for d=0, Y for d=1)
            k_side((1, 1, L, H)),        # key-side sequence   (Y for d=0, X for d=1)
            q_side((1, 1, 1, L)),        # softmax row-weight mask (query-side mask)
            k_side((1, 1, L, 1)),        # pooling column mask     (key-side mask)
            shared((H, K)), shared((1, K)),      # Q_net weight / bias
            shared((H, K)), shared((1, K)),      # K_net weight / bias
            shared((1, K)),                      # h_mat
        ],
        out_specs=pl.BlockSpec((1, 1, 1, K), lambda b, d: (b, d, 0, 0)),
        out_shape=jax.ShapeDtypeStruct((B, 2, 1, K), jnp.float32),
        scratch_shapes=[pltpu.VMEM((L, K), mm_dtype),        # kb for the S matmul
                        pltpu.VMEM((L, K), jnp.float32)],    # cm-masked kb for the GEMV
        compiler_params=pltpu.CompilerParams(
            dimension_semantics=("parallel", "parallel"),
            # headroom for larger column tiles; actual working set at L=2000 is ~13 MB
            vmem_limit_bytes=64 * 1024 * 1024),
        cost_estimate=cost,
    )(xy, xy, m_row, m_col, wq, p["bq"], wk, p["bk"], p["h_mat"])

    # Epilogue (tiny B*K XLA op): sum the two directions, fold the 1/L mean-pool and the
    # inference-mode BatchNorm into a single scale/shift.
    scale = p["gamma"] * lax.rsqrt(p["rvar"] + BN_EPS)        # (1, K)
    shift = p["beta_bn"] - p["rmean"] * scale                 # (1, K)
    pooled = pooled.reshape(B, 2, K).sum(axis=1)
    return pooled * (scale / L) + shift


def ref_forward(X, Y, mask1, mask2, p, mm_dtype=jnp.float32):
    """Pure-JAX reference mirroring the PyTorch forward (eval mode).

    mm_dtype rounds the matmul operands exactly like the kernel's MXU path does
    (f32 accumulation everywhere); pass float32 for the exact PyTorch math.
    """
    md = mm_dtype

    def fcnet(inp, w, b):
        z = jnp.einsum("blh,hk->blk", inp.astype(md), w.astype(md),
                       preferred_element_type=jnp.float32) + b
        return jax.nn.relu(z)

    a1x = fcnet(X, p["wq"], p["bq"])
    a1y = fcnet(Y, p["wk"], p["bk"])
    a2y = fcnet(Y, p["wq"], p["bq"])
    a2x = fcnet(X, p["wk"], p["bk"])
    h = p["h_mat"][0]                   # (K,)
    hb = p["h_bias"][0, 0]
    A1 = jnp.einsum("bvk,bqk->bvq", (a1x * h).astype(md), a1y.astype(md),
                    preferred_element_type=jnp.float32) + hb
    A2 = jnp.einsum("bqk,bvk->bqv", (a2y * h).astype(md), a2x.astype(md),
                    preferred_element_type=jnp.float32) + hb
    m1e = mask1[:, None, :]
    m2e = mask2[:, None, :]
    alpha = jax.nn.softmax(jnp.where(m2e > 0, A1, NEG_INF), axis=1) * m2e
    beta = jax.nn.softmax(jnp.where(m1e > 0, A2, NEG_INF), axis=1) * m1e
    lx = jnp.einsum("bvq,bqk->bvk", alpha, a1y) * mask1[:, :, None]
    ly = jnp.einsum("bqv,bvk->bqk", beta, a2x) * mask2[:, :, None]
    pooled = lx.mean(axis=1) + ly.mean(axis=1)
    return ((pooled - p["rmean"][0]) / jnp.sqrt(p["rvar"][0] + BN_EPS)
            * p["gamma"][0] + p["beta_bn"][0])


def init_params(key, hidden_dim, k):
    K = hidden_dim * k
    keys = jax.random.split(key, 8)

    def weight_norm_linear(kw, kb):
        # PyTorch Linear weight (out, in); weight_norm(dim=None): W = g * V / ||V||_F
        v = jax.random.normal(kw, (K, hidden_dim), jnp.float32) / np.sqrt(hidden_dim)
        g = jnp.linalg.norm(v)                      # init: g = ||v||  ->  W == v
        w_eff = g * v / jnp.linalg.norm(v)
        b = jax.random.normal(kb, (K,), jnp.float32) * 0.1
        return w_eff.T, b.reshape(1, K)             # (H, K), (1, K)

    wq, bq = weight_norm_linear(keys[0], keys[1])
    wk, bk = weight_norm_linear(keys[2], keys[3])
    h_mat = jax.random.normal(keys[4], (1, K), jnp.float32)
    h_bias = jax.random.normal(keys[5], (1, 1), jnp.float32)
    return dict(
        wq=wq, bq=bq, wk=wk, bk=bk, h_mat=h_mat, h_bias=h_bias,
        gamma=jnp.ones((1, K), jnp.float32),
        beta_bn=jnp.zeros((1, K), jnp.float32),
        rmean=jnp.zeros((1, K), jnp.float32),
        rvar=jnp.ones((1, K), jnp.float32),
    )


if __name__ == "__main__":
    B, L, H, kmul = 2, 16, 32, 2       # small synthetic shapes (L stands in for 2000)
    key = jax.random.PRNGKey(0)
    kx, ky, km1, km2, kp = jax.random.split(key, 5)

    X = jax.random.normal(kx, (B, L, H), jnp.float32)
    Y = jax.random.normal(ky, (B, L, H), jnp.float32)
    mask1 = (jax.random.uniform(km1, (B, L)) > 0.3).astype(jnp.float32)
    mask2 = (jax.random.uniform(km2, (B, L)) > 0.3).astype(jnp.float32)
    params = init_params(kp, H, kmul)

    # 1) Exact-precision check: f32 MXU operands vs the PyTorch-faithful f32 reference
    #    (validates the tiling + softmax/pooling algebra exactly).
    out_f32 = jax.block_until_ready(
        bcc_forward(X, Y, mask1, mask2, params, mm_dtype=jnp.float32))
    ref_f32 = jax.block_until_ready(
        ref_forward(X, Y, mask1, mask2, params, mm_dtype=jnp.float32))
    np.testing.assert_allclose(np.asarray(out_f32), np.asarray(ref_f32),
                               rtol=2e-3, atol=2e-3)

    # 2) Production fast path: bf16 MXU operands (f32 accumulation), compared against a
    #    reference that applies the same operand rounding.
    out_bf16 = jax.block_until_ready(
        bcc_forward(X, Y, mask1, mask2, params, mm_dtype=jnp.bfloat16))
    ref_bf16 = jax.block_until_ready(
        ref_forward(X, Y, mask1, mask2, params, mm_dtype=jnp.bfloat16))
    np.testing.assert_allclose(np.asarray(out_bf16), np.asarray(ref_bf16),
                               rtol=1e-2, atol=1e-2)

    assert out_bf16.shape == (B, H * kmul)
    print("KERNEL_OK")
</pallas_src>

<mosaic_0001>
module attributes {stable_mosaic.version = 11 : i64} {
  func.func @_bcc_direction_kernel(%arg0: i32, %arg1: i32, %arg2: memref<1x1x16x32xf32, #tpu.memory_space<vmem>>, %arg3: memref<1x1x16x32xf32, #tpu.memory_space<vmem>>, %arg4: memref<1x1x1x16xf32, #tpu.memory_space<vmem>>, %arg5: memref<1x1x16x1xf32, #tpu.memory_space<vmem>>, %arg6: memref<32x64xf32, #tpu.memory_space<vmem>>, %arg7: memref<1x64xf32, #tpu.memory_space<vmem>>, %arg8: memref<32x64xf32, #tpu.memory_space<vmem>>, %arg9: memref<1x64xf32, #tpu.memory_space<vmem>>, %arg10: memref<1x64xf32, #tpu.memory_space<vmem>>, %arg11: memref<1x1x1x64xf32, #tpu.memory_space<vmem>>, %arg12: memref<16x64xf32, #tpu.memory_space<vmem>>, %arg13: memref<16x64xf32, #tpu.memory_space<vmem>>) attributes {dimension_semantics = [#tpu.dimension_semantics<parallel>, #tpu.dimension_semantics<parallel>], iteration_bounds = array<i64: 2, 2>, scalar_prefetch = 0 : i64, scratch_operands = 2 : i64, tpu.core_type = #tpu.core_type<tc>, window_params = [{transform_indices = @transform_0, window_bounds = array<i64: 1, 1, 16, 32>}, {transform_indices = @transform_1, window_bounds = array<i64: 1, 1, 16, 32>}, {transform_indices = @transform_2, window_bounds = array<i64: 1, 1, 1, 16>}, {transform_indices = @transform_3, window_bounds = array<i64: 1, 1, 16, 1>}, {pipeline_mode = #tpu.pipeline_mode<synchronous>, transform_indices = @transform_4, window_bounds = array<i64: 32, 64>}, {pipeline_mode = #tpu.pipeline_mode<synchronous>, transform_indices = @transform_5, window_bounds = array<i64: 1, 64>}, {pipeline_mode = #tpu.pipeline_mode<synchronous>, transform_indices = @transform_6, window_bounds = array<i64: 32, 64>}, {pipeline_mode = #tpu.pipeline_mode<synchronous>, transform_indices = @transform_7, window_bounds = array<i64: 1, 64>}, {pipeline_mode = #tpu.pipeline_mode<synchronous>, transform_indices = @transform_8, window_bounds = array<i64: 1, 64>}, {transform_indices = @transform_9, window_bounds = array<i64: 1, 1, 1, 64>}]} {
    %c0 = arith.constant 0 : index
    %c0_0 = arith.constant 0 : index
    %c0_1 = arith.constant 0 : index
    %c0_2 = arith.constant 0 : index
    %0 = vector.load %arg2[%c0, %c0_0, %c0_1, %c0_2] : memref<1x1x16x32xf32, #tpu.memory_space<vmem>>, vector<1x1x16x32xf32>
    %1 = vector.shape_cast %0 : vector<1x1x16x32xf32> to vector<16x32xf32>
    %c0_3 = arith.constant 0 : index
    %c0_4 = arith.constant 0 : index
    %c0_5 = arith.constant 0 : index
    %c0_6 = arith.constant 0 : index
    %2 = vector.load %arg3[%c0_3, %c0_4, %c0_5, %c0_6] : memref<1x1x16x32xf32, #tpu.memory_space<vmem>>, vector<1x1x16x32xf32>
    %3 = vector.shape_cast %2 : vector<1x1x16x32xf32> to vector<16x32xf32>
    %c0_7 = arith.constant 0 : index
    %c0_8 = arith.constant 0 : index
    %c0_9 = arith.constant 0 : index
    %c0_10 = arith.constant 0 : index
    %4 = vector.load %arg4[%c0_7, %c0_8, %c0_9, %c0_10] : memref<1x1x1x16xf32, #tpu.memory_space<vmem>>, vector<1x1x1x16xf32>
    %5 = vector.shape_cast %4 : vector<1x1x1x16xf32> to vector<1x16xf32>
    %c0_11 = arith.constant 0 : index
    %c0_12 = arith.constant 0 : index
    %c0_13 = arith.constant 0 : index
    %c0_14 = arith.constant 0 : index
    %6 = vector.load %arg5[%c0_11, %c0_12, %c0_13, %c0_14] : memref<1x1x16x1xf32, #tpu.memory_space<vmem>>, vector<1x1x16x1xf32>
    %7 = vector.shape_cast %6 : vector<1x1x16x1xf32> to vector<16x1xf32>
    %c0_15 = arith.constant 0 : index
    %c0_16 = arith.constant 0 : index
    %8 = vector.load %arg6[%c0_15, %c0_16] : memref<32x64xf32, #tpu.memory_space<vmem>>, vector<32x64xf32>
    %cst = arith.constant dense<0.000000e+00> : vector<16x64xf32>
    %9 = tpu.matmul %1, %8, %cst {dimension_numbers = #tpu.dot_dimension_numbers<[1], [0], [0], [1], [0, 0, 1, 1], [], []>} : vector<16x32xf32>, vector<32x64xf32>, vector<16x64xf32> -> vector<16x64xf32>
    %c0_17 = arith.constant 0 : index
    %c0_18 = arith.constant 0 : index
    %10 = vector.load %arg7[%c0_17, %c0_18] : memref<1x64xf32, #tpu.memory_space<vmem>>, vector<1x64xf32>
    %11 = vector.broadcast %10 : vector<1x64xf32> to vector<16x64xf32>
    %12 = arith.addf %9, %11 : vector<16x64xf32>
    %cst_19 = arith.constant 0.000000e+00 : f32
    %13 = vector.broadcast %cst_19 : f32 to vector<16x64xf32>
    %14 = arith.maximumf %12, %13 : vector<16x64xf32>
    %c0_20 = arith.constant 0 : index
    %c0_21 = arith.constant 0 : index
    %15 = vector.load %arg8[%c0_20, %c0_21] : memref<32x64xf32, #tpu.memory_space<vmem>>, vector<32x64xf32>
    %cst_22 = arith.constant dense<0.000000e+00> : vector<16x64xf32>
    %16 = tpu.matmul %3, %15, %cst_22 {dimension_numbers = #tpu.dot_dimension_numbers<[1], [0], [0], [1], [0, 0, 1, 1], [], []>} : vector<16x32xf32>, vector<32x64xf32>, vector<16x64xf32> -> vector<16x64xf32>
    %c0_23 = arith.constant 0 : index
    %c0_24 = arith.constant 0 : index
    %17 = vector.load %arg9[%c0_23, %c0_24] : memref<1x64xf32, #tpu.memory_space<vmem>>, vector<1x64xf32>
    %18 = vector.broadcast %17 : vector<1x64xf32> to vector<16x64xf32>
    %19 = arith.addf %16, %18 : vector<16x64xf32>
    %cst_25 = arith.constant 0.000000e+00 : f32
    %20 = vector.broadcast %cst_25 : f32 to vector<16x64xf32>
    %21 = arith.maximumf %19, %20 : vector<16x64xf32>
    %c0_26 = arith.constant 0 : index
    %c0_27 = arith.constant 0 : index
    %22 = vector.load %arg10[%c0_26, %c0_27] : memref<1x64xf32, #tpu.memory_space<vmem>>, vector<1x64xf32>
    %23 = vector.broadcast %22 : vector<1x64xf32> to vector<16x64xf32>
    %24 = arith.mulf %14, %23 : vector<16x64xf32>
    %c0_28 = arith.constant 0 : index
    %c0_29 = arith.constant 0 : index
    %25 = vector.load %arg12[%c0_28, %c0_29] : memref<16x64xf32, #tpu.memory_space<vmem>>, vector<16x64xf32>
    tpu.vector_store %arg12[%c0_28, %c0_29], %21 {strides = array<i32>} : memref<16x64xf32, #tpu.memory_space<vmem>>, vector<16x64xf32>,
    %26 = vector.broadcast %7 : vector<16x1xf32> to vector<16x64xf32>
    %27 = arith.mulf %21, %26 : vector<16x64xf32>
    %c0_30 = arith.constant 0 : index
    %c0_31 = arith.constant 0 : index
    %28 = vector.load %arg13[%c0_30, %c0_31] : memref<16x64xf32, #tpu.memory_space<vmem>>, vector<16x64xf32>
    tpu.vector_store %arg13[%c0_30, %c0_31], %27 {strides = array<i32>} : memref<16x64xf32, #tpu.memory_space<vmem>>, vector<16x64xf32>,
    %cst_32 = arith.constant 1.000000e+00 : f32
    %29 = vector.broadcast %cst_32 : f32 to vector<1x16xf32>
    %30 = tpu.concatenate %5, %29 in 0 : vector<1x16xf32>, vector<1x16xf32> -> vector<2x16xf32>
    %cst_33 = arith.constant 0.000000e+00 : f32
    %31 = vector.broadcast %cst_33 : f32 to vector<1x64xf32>
    %c0_i32 = arith.constant 0 : i32
    %c16_i32 = arith.constant 16 : i32
    %32 = arith.muli %c0_i32, %c16_i32 : i32
    %33 = tpu.assume_multiple %32, 16 : i32
    %34 = arith.index_cast %33 : i32 to index
    %c0_34 = arith.constant 0 : index
    %35 = vector.load %arg12[%34, %c0_34] : memref<16x64xf32, #tpu.memory_space<vmem>>, vector<16x64xf32>
    %cst_35 = arith.constant dense<0.000000e+00> : vector<16x16xf32>
    %36 = tpu.matmul %24, %35, %cst_35 {dimension_numbers = #tpu.dot_dimension_numbers<[1], [1], [0], [0], [0, 0, 1, 0], [], []>} : vector<16x64xf32>, vector<16x64xf32>, vector<16x16xf32> -> vector<16x16xf32>
    %cst_36 = arith.constant dense<0xFF800000> : vector<16xf32>
    %37 = vector.multi_reduction <maximumf>, %36, %cst_36 [0] : vector<16x16xf32> to vector<16xf32>
    %38 = vector.shape_cast %37 : vector<16xf32> to vector<1x16xf32>
    %39 = vector.broadcast %38 : vector<1x16xf32> to vector<16x16xf32>
    %40 = arith.subf %36, %39 : vector<16x16xf32>
    %41 = math.exp %40 : vector<16x16xf32>
    %cst_37 = arith.constant dense<0.000000e+00> : vector<2x16xf32>
    %42 = tpu.matmul %30, %41, %cst_37 {dimension_numbers = #tpu.dot_dimension_numbers<[1], [0], [0], [1], [0, 0, 1, 1], [], []>} : vector<2x16xf32>, vector<16x16xf32>, vector<2x16xf32> -> vector<2x16xf32>
    %43 = vector.extract_strided_slice %42 {offsets = [0, 0], sizes = [1, 16], strides = [1, 1]} : vector<2x16xf32> to vector<1x16xf32>
    %44 = vector.extract_strided_slice %42 {offsets = [1, 0], sizes = [1, 16], strides = [1, 1]} : vector<2x16xf32> to vector<1x16xf32>
    %45 = tpu.reciprocal %44 : vector<1x16xf32> -> vector<1x16xf32>
    %46 = arith.mulf %43, %45 : vector<1x16xf32>
    %47 = arith.index_cast %33 : i32 to index
    %c0_38 = arith.constant 0 : index
    %48 = vector.load %arg13[%47, %c0_38] : memref<16x64xf32, #tpu.memory_space<vmem>>, vector<16x64xf32>
    %cst_39 = arith.constant dense<0.000000e+00> : vector<1x64xf32>
    %49 = tpu.matmul %46, %48, %cst_39 {dimension_numbers = #tpu.dot_dimension_numbers<[1], [0], [0], [1], [0, 0, 1, 1], [], []>} : vector<1x16xf32>, vector<16x64xf32>, vector<1x64xf32> -> vector<1x64xf32>
    %50 = arith.addf %31, %49 : vector<1x64xf32>
    %c1_i32 = arith.constant 1 : i32
    %c0_40 = arith.constant 0 : index
    %c0_41 = arith.constant 0 : index
    %c0_42 = arith.constant 0 : index
    %c0_43 = arith.constant 0 : index
    %51 = vector.load %arg11[%c0_40, %c0_41, %c0_42, %c0_43] : memref<1x1x1x64xf32, #tpu.memory_space<vmem>>, vector<1x1x1x64xf32>
    %52 = vector.shape_cast %51 : vector<1x1x1x64xf32> to vector<1x64xf32>
    %53 = vector.shape_cast %50 : vector<1x64xf32> to vector<1x1x1x64xf32>
    tpu.vector_store %arg11[%c0_40, %c0_41, %c0_42, %c0_43], %53 {strides = array<i32>} : memref<1x1x1x64xf32, #tpu.memory_space<vmem>>, vector<1x1x1x64xf32>,
    return
  }
  func.func @transform_0(%arg0: i32, %arg1: i32) -> (i32, i32, i32, i32) {
    %c0_i32 = arith.constant 0 : i32
    %c0_i32_0 = arith.constant 0 : i32
    %c0_i32_1 = arith.constant 0 : i32
    return %arg1, %arg0, %c0_i32, %c0_i32_0 : i32, i32, i32, i32
  }
  func.func @transform_1(%arg0: i32, %arg1: i32) -> (i32, i32, i32, i32) {
    %c1_i32 = arith.constant 1 : i32
    %0 = arith.subi %c1_i32, %arg1 : i32
    %c0_i32 = arith.constant 0 : i32
    %c0_i32_0 = arith.constant 0 : i32
    %c0_i32_1 = arith.constant 0 : i32
    return %0, %arg0, %c0_i32, %c0_i32_0 : i32, i32, i32, i32
  }
  func.func @transform_2(%arg0: i32, %arg1: i32) -> (i32, i32, i32, i32) {
    %c0_i32 = arith.constant 0 : i32
    %c0_i32_0 = arith.constant 0 : i32
    %c0_i32_1 = arith.constant 0 : i32
    return %arg1, %arg0, %c0_i32, %c0_i32_0 : i32, i32, i32, i32
  }
  func.func @transform_3(%arg0: i32, %arg1: i32) -> (i32, i32, i32, i32) {
    %c1_i32 = arith.constant 1 : i32
    %0 = arith.subi %c1_i32, %arg1 : i32
    %c0_i32 = arith.constant 0 : i32
    %c0_i32_0 = arith.constant 0 : i32
    %c0_i32_1 = arith.constant 0 : i32
    return %0, %arg0, %c0_i32, %c0_i32_0 : i32, i32, i32, i32
  }
  func.func @transform_4(%arg0: i32, %arg1: i32) -> (i32, i32) {
    %c0_i32 = arith.constant 0 : i32
    %c0_i32_0 = arith.constant 0 : i32
    %c0_i32_1 = arith.constant 0 : i32
    return %c0_i32, %c0_i32_0 : i32, i32
  }
  func.func @transform_5(%arg0: i32, %arg1: i32) -> (i32, i32) {
    %c0_i32 = arith.constant 0 : i32
    %c0_i32_0 = arith.constant 0 : i32
    %c0_i32_1 = arith.constant 0 : i32
    return %c0_i32, %c0_i32_0 : i32, i32
  }
  func.func @transform_6(%arg0: i32, %arg1: i32) -> (i32, i32) {
    %c0_i32 = arith.constant 0 : i32
    %c0_i32_0 = arith.constant 0 : i32
    %c0_i32_1 = arith.constant 0 : i32
    return %c0_i32, %c0_i32_0 : i32, i32
  }
  func.func @transform_7(%arg0: i32, %arg1: i32) -> (i32, i32) {
    %c0_i32 = arith.constant 0 : i32
    %c0_i32_0 = arith.constant 0 : i32
    %c0_i32_1 = arith.constant 0 : i32
    return %c0_i32, %c0_i32_0 : i32, i32
  }
  func.func @transform_8(%arg0: i32, %arg1: i32) -> (i32, i32) {
    %c0_i32 = arith.constant 0 : i32
    %c0_i32_0 = arith.constant 0 : i32
    %c0_i32_1 = arith.constant 0 : i32
    return %c0_i32, %c0_i32_0 : i32, i32
  }
  func.func @transform_9(%arg0: i32, %arg1: i32) -> (i32, i32, i32, i32) {
    %c0_i32 = arith.constant 0 : i32
    %c0_i32_0 = arith.constant 0 : i32
    %c0_i32_1 = arith.constant 0 : i32
    return %arg0, %arg1, %c0_i32, %c0_i32_0 : i32, i32, i32, i32
  }
}

</mosaic_0001>

<bundles_post_ra>
// kernel: tpu_custom_call.1
= control target key start
LH: loop header
LB: loop body
LE: loop exit
PB: predicated region body
PF: predicated region fallthrough
CT: control target
= control target key end

     0   :  { %s2642_s0 = inlined_call_operand.hbm [shape: f32[2,2,16,32], index: 0, kind: input, shape index: {}]   ;;  %s2643_s1 = inlined_call_operand.hbm [shape: f32[2,2,16,32], index: 1, kind: input, shape index: {}]   ;;  %s2644_s2 = inlined_call_operand.hbm [shape: f32[2,2,1,16], index: 2, kind: input, shape index: {}]   ;;  %s2645_s3 = inlined_call_operand.hbm [shape: f32[2,2,16,1], index: 3, kind: input, shape index: {}]   ;;  %s2646_s4 = inlined_call_operand.hbm [shape: f32[32,64], index: 4, kind: input, shape index: {}]   ;;  %s2647_s5 = inlined_call_operand.hbm [shape: f32[1,64], index: 5, kind: input, shape index: {}]   ;;  %s2648_s6 = inlined_call_operand.hbm [shape: f32[32,64], index: 6, kind: input, shape index: {}]   ;;  %s2649_s7 = inlined_call_operand.hbm [shape: f32[1,64], index: 7, kind: input, shape index: {}]   ;;  %s2650_s8 = inlined_call_operand.hbm [shape: f32[1,64], index: 8, kind: input, shape index: {}]   ;;  %s2651_s9 = inlined_call_operand.hbm [shape: f32[2,2,1,64], index: 9, kind: output, shape index: {}]  }
   0x1   :  { %2682 = sst [smem:[#allocation41_spill]] %s2642_s0 }
   0x2   :  { %2683 = sst [smem:[#allocation42_spill]] %s2643_s1 }
   0x3   :  { %2684 = sst [smem:[#allocation43_spill]] %s2644_s2 }
   0x4   :  { %2685 = sst [smem:[#allocation44_spill]] %s2646_s4 }
   0x5   :  { %2686 = sst [smem:[#allocation45_spill]] %s2647_s5 }
   0x6   :  { %2687 = sst [smem:[#allocation46_spill]] %s2648_s6 }
   0x7   :  { %2688 = sst [smem:[#allocation47_spill]] %s2649_s7 }
   0x8   :  { %2689 = sst [smem:[#allocation48_spill]] %s2650_s8 }
   0x9   :  { %2690 = sst [smem:[#allocation49_spill]] %s2651_s9 }
   0xa   :  { %14 = vsyncpa [#allocation5], 0 }
   0xb   :  { %16 = vsyncpa [#allocation5 + $0x1], 0 }
   0xc   :  { %17 = vsyncpa [#allocation8], 0 }
   0xd   :  { %19 = vsyncpa [#allocation8 + $0x1], 0 }
   0xe   :  { %20 = vsyncpa [#allocation11], 0 }
   0xf   :  { %22 = vsyncpa [#allocation11 + $0x1], 0 }
  0x10   :  { %23 = vsyncpa [#allocation14], 0 }
  0x11   :  { %24 = vsyncpa [#allocation17], 0 }
  0x12   :  { %25 = vsyncpa [#allocation6], 0 }
  0x13   :  { %27 = vsyncpa [#allocation6 + $0x1], 0  ;;  %s2061_s30 = smov 0   ;;  %s2063_s10 = smov 0  }
  0x14   :  { %s2065_s11 = smov 0   ;;  %s2067_s12 = smov 0  }
  0x15   :  { %s2069_s13 = smov 0   ;;  %s2071_s14 = smov 0  }
  0x16   :  { %s2073_s15 = smov 0   ;;  %s2075_s16 = smov 0  }
  0x17   :  { %s2077_s17 = smov 0   ;;  %s2079_s18 = smov 0  }
  0x18   :  { %s2081_s19 = smov 0  }
  0x19 LB: > { %2691 = sst [smem:[#allocation28_spill]] %s1961_s11  ;;  %s2117_s20 = sadd.s32 4294967295, %s1993_s19   ;;  %s1993_s19 = sphi %s2081_s19, %s33_s19   ;;  %s1989_s18 = sphi %s2079_s18, %s2763_s18   ;;  %s1985_s17 = sphi %s2077_s17, %s2762_s17   ;;  %s1981_s16 = sphi %s2075_s16, %s2761_s16   ;;  %s1977_s15 = sphi %s2073_s15, %s2760_s15   ;;  %s1973_s14 = sphi %s2071_s14, %s2759_s14   ;;  %s1969_s13 = sphi %s2069_s13, %s2758_s13   ;;  %s1965_s12 = sphi %s2067_s12, %s2757_s12   ;;  %s1961_s11 = sphi %s2065_s11, %s2756_s11   ;;  %s1957_s10 = sphi %s2063_s10, %s2765_s10   ;;  %s1953_s30 = sphi %s2061_s30, %s2764_s30  }
  0x1a   : > { %2692 = sst [smem:[#allocation29_spill]] %s1965_s12  ;;  %p1266_p0 = scmp.ge.s32.totalorder %s1993_s19, 1 }
  0x1b   : > { %2693 = sst [smem:[#allocation30_spill]] %s1969_s13  ;;  %p2657_p1 = scmp.eq.s32.totalorder %s2117_s20, 0 }
  0x1c   : > { %2694 = sst [smem:[#allocation31_spill]] %s1973_s14  ;;  %p299_p2 = scmp.lt.s32.totalorder %s1993_s19, 5 }
  0x1d   : > { %2695 = sst [smem:[#allocation32_spill]] %s1977_s15  ;;  %s1995_s22 = smov [#allocation12]  }
  0x1e   : > { %2696 = sst [smem:[#allocation33_spill]] %s1981_s16  ;;  %p2122_p3 = pnand %p1266_p0, %p299_p2 }
  0x1f   : > { %2697 = sst [smem:[#allocation34_spill]] %s1985_s17  ;;  %s311_s23 = sshll.u32 %s1995_s22, 4  ;;  %s2126_s23 = int_to_ptr.vmem [resolvable:$true] %s311_s23 }
  0x20   : > { %2698 = sst [smem:[#allocation35_spill]] %s1989_s18  ;;  %p1436_p4 = pneg %p2122_p3 }
  0x21   : > { %s2699_s21 = scalar_select %p2122_p3, 1, 0 }
  0x22   : > { %p2132_p5 = pnand %p1436_p4, %p2657_p1  ;;  %s1996_s25 = smov [#allocation13]  }
  0x23   : > { %2700 = sst [smem:[#allocation36_spill]] %s2699_s21  ;;  %s325_s26 = sshll.u32 %s1996_s25, 4  ;;  %s2136_s26 = int_to_ptr.vmem [resolvable:$true] %s325_s26 }
  0x24   : > { %s2701_s24 = scalar_select %p2132_p5, 1, 0 }
  0x25   : > { %s1997_s27 = smov [#allocation16]   ;;  %s2702_s4 = sld [smem:[#allocation44_spill]] }
  0x26   : > { %s2138_s28 = sshll.u32 %s1997_s27, 4  ;;  %p2148_p7 = pneg %p2132_p5  ;;  %s350_s28 = int_to_ptr.vmem [resolvable:$true] %s2138_s28 }
  0x2b   : > { %s1587_s22 = scalar_lea.hbm %s2702_s4, 512 }
  0x2c   : > { %p1588_p6 = scmp.ne.s32.totalorder %s2702_s4, %s1587_s22  ;;  %p1594_p10 = scmp.lt.u32.totalorder %s1587_s22, %s2702_s4 }
  0x2e   : > { %p1590_p8 = pnand %p2148_p7, %p1588_p6 }
  0x30   : > { %p1591_p9 = pneg %p1590_p8 }
  0x32   : > { %p1596_p11 = pnand %p1594_p10, %p1591_p9 }
  0x34   : > { %1599 = shalt.err (!%p1596_p11)
}
  0x35   : > { %s1600_s9 = scalar_lea.vmem %s2126_s23, 512  ;;  %p1608_p2 = scmp.lt.s32.totalorder %s2126_s23, %s2126_s23 }
  0x36   : > { %p1601_p12 = scmp.ne.s32.totalorder %s2126_s23, %s1600_s9  ;;  %p1609_p4 = scmp.lt.s32.totalorder %s1600_s9, %s1600_s9 }
  0x38   : > { %p1603_p13 = pnand %p1601_p12, %p2148_p7  ;;  %p1610_p6 = por %p1609_p4, %p1608_p2 }
  0x3a   : > { %p1604_p0 = pneg %p1603_p13 }
  0x3c   : > { %p1611_p8 = pnand %p1610_p6, %p1604_p0 }
  0x3e   : > { %1614 = shalt.err (!%p1611_p8)
}
  0x3f   : > { %s2659_s15 = smov 128   ;;  %s2661_s16 = smov 8  }
  0x40   : > { %1439 = dma.hbm_to_vmem [thread:$0]  (!%p2132_p5), %s2702_s4, 512, %s2126_s23, [#allocation11], %s2659_s15, %s2659_s15, %s2661_s16  }
  0x41   : > { %s2704_s5 = sld [smem:[#allocation45_spill]] }
  0x47   : > { %s1615_s9 = scalar_lea.hbm %s2704_s5, 16 }
  0x48   : > { %p1616_p9 = scmp.ne.s32.totalorder %s2704_s5, %s1615_s9  ;;  %p1622_p12 = scmp.lt.u32.totalorder %s1615_s9, %s2704_s5 }
  0x4a   : > { %p1618_p10 = pnand %p1616_p9, %p2148_p7 }
  0x4c   : > { %p1619_p11 = pneg %p1618_p10 }
  0x4e   : > { %p1624_p13 = pnand %p1622_p12, %p1619_p11 }
  0x50   : > { %1627 = shalt.err (!%p1624_p13)
}
  0x51   : > { %s1628_s23 = scalar_lea.vmem %s2136_s26, 16  ;;  %s1635_s0 = scalar_lea.vmem %s2136_s26, 32 }
  0x52   : > { %p1629_p0 = scmp.ne.s32.totalorder %s2136_s26, %s1628_s23  ;;  %p1636_p6 = scmp.lt.s32.totalorder %s2136_s26, %s2136_s26 }
  0x53   : > { %p1637_p8 = scmp.lt.s32.totalorder %s1635_s0, %s1628_s23 }
  0x54   : > { %p1631_p2 = pnand %p1629_p0, %p2148_p7 }
  0x55   : > { %p1638_p9 = por %p1637_p8, %p1636_p6 }
  0x56   : > { %p1632_p4 = pneg %p1631_p2 }
  0x58   : > { %p1639_p10 = pnand %p1638_p9, %p1632_p4 }
  0x5a   : > { %1642 = shalt.err (!%p1639_p10)
}
  0x5b   : > { %1442 = dma.hbm_to_vmem [thread:$0]  (!%p2132_p5), %s2704_s5, 16, %s2136_s26, [#allocation14]  }
  0x5c   : > { %s2705_s7 = sld [smem:[#allocation47_spill]] }
  0x62   : > { %s1643_s22 = scalar_lea.hbm %s2705_s7, 16 }
  0x63   : > { %p1644_p11 = scmp.ne.s32.totalorder %s2705_s7, %s1643_s22  ;;  %p1650_p0 = scmp.lt.u32.totalorder %s1643_s22, %s2705_s7 }
  0x65   : > { %p1646_p12 = pnand %p1644_p11, %p2148_p7 }
  0x67   : > { %p1647_p13 = pneg %p1646_p12 }
  0x69   : > { %p1652_p2 = pnand %p1650_p0, %p1647_p13 }
  0x6b   : > { %1655 = shalt.err (!%p1652_p2)
}
  0x6c   : > { %s1656_s0 = scalar_lea.vmem %s350_s28, 16  ;;  %s1663_s26 = scalar_lea.vmem %s350_s28, 32 }
  0x6d   : > { %p1657_p4 = scmp.ne.s32.totalorder %s350_s28, %s1656_s0  ;;  %p1664_p9 = scmp.lt.s32.totalorder %s350_s28, %s350_s28 }
  0x6e   : > { %p1665_p10 = scmp.lt.s32.totalorder %s1663_s26, %s1656_s0 }
  0x6f   : > { %p1659_p6 = pnand %p1657_p4, %p2148_p7 }
  0x70   : > { %p1666_p1 = por %p1665_p10, %p1664_p9 }
  0x71   : > { %p1660_p8 = pneg %p1659_p6 }
  0x73   : > { %p1667_p3 = pnand %p1666_p1, %p1660_p8 }
  0x75   : > { %1670 = shalt.err (!%p1667_p3)
}
  0x76   : > { %1448 = dma.hbm_to_vmem [thread:$0]  (!%p2132_p5), %s2705_s7, 16, %s350_s28, [#allocation17]  }
  0x77   : > { %s42_s13 = sadd.s32 1, %s1985_s17  ;;  %s45_s29 = sadd.s32 1, %s1989_s18 }
  0x78   : > { %p43_p1 = scmp.ge.s32.totalorder %s42_s13, 2  ;;  %p2666_p3 = scmp.eq.s32.totalorder %s1993_s19, 0 }
  0x79   : > { %s77_s22 = ssub.s32 1, %s1985_s17  ;;  %s84_s9 = sadd.s32 1, %s1961_s11 }
  0x7a   : > { %s2767_s13 = smov (%p43_p1, %s42_s13), 0  ;;  %s2769_s29 = smov (!%p43_p1, %s45_s29), %s1989_s18 }
  0x7b   : > { %2706 = sst [smem:[#allocation37_spill]] %s2767_s13  ;;  %s49_s25 = ssub.s32 %s1985_s17, %s2767_s13 }
  0x7c   : > { %s78_s27 = ssub.s32 1, %s2767_s13  ;;  %p47_p11 = scmp.ge.s32.totalorder %s2769_s29, 2 }
  0x7d   : > { %s79_s28 = ssub.s32 %s77_s22, %s78_s27  ;;  %p91_p12 = scmp.ne.s32.totalorder %s1961_s11, %s1957_s10 }
  0x7e   : > { %s2771_s29 = smov (%p47_p11, %s2769_s29), 0  ;;  %p97_p0 = scmp.ne.s32.totalorder %s1957_s10, %s1953_s30 }
  0x7f   : > { %2707 = sst [smem:[#allocation38_spill]] %s2771_s29  ;;  %p2232_p13 = por %p91_p12, %p2666_p3 }
  0x80   : > { %s50_s0 = ssub.s32 %s1989_s18, %s2771_s29  ;;  %p2665_p2 = scmp.lt.s32.totalorder %s1993_s19, 4 }
  0x81   : > { %s2241_s26 = sor.u32 %s50_s0, %s49_s25  ;;  %s81_s2 = sor.u32 %s79_s28, %s50_s0 }
  0x82   : > { %p82_p6 = scmp.eq.s32.totalorder %s81_s2, 0  ;;  %p2709_p8 = scmp.eq.s32.totalorder %s2117_s20, 0 }
  0x83   : > { %s2671_s27 = sshll.u32 %s1989_s18, 1  ;;  %s2670_s30 = sand.u32 1, %s1993_s19  }
  0x84   : > { %p2246_p9 = por %p97_p0, %p2709_p8  ;;  %s396_s16 = sand.u32 1, %s1961_s11  }
  0x85   : > { %s2252_s15 = scalar_select %p82_p6, %s1961_s11, %s84_s9  }
  0x86   : > { %s2710_s12 = scalar_select %p2246_p9, 1, 0 }
  0x87   : > { %2711 = sst [smem:[#allocation39_spill]] %s2252_s15  ;;  %s2256_s4 = sshll.u32 %s396_s16, 4 }
  0x88   : > { %s1279_s25 = sshll.u32 %s77_s22, 2  ;;  %s398_s0 = scalar_lea.vmem [#allocation7], %s2256_s4 }
  0x89   : > { %s405_s28 = sadd.s32 %s1279_s25, %s2671_s27  ;;  %s408_s5 = sshll.u32 %s398_s0, 4  ;;  %s2261_s5 = int_to_ptr.vmem [resolvable:$true] %s408_s5 }
  0x8a   : > { %s1280_s2 = sshll.u32 %s405_s28, 7  ;;  %s2712_s1 = sld [smem:[#allocation42_spill]] }
  0x8b   : > { %p2272_p10 = pnand %p2665_p2, %p2232_p13  ;;  %s2279_s25 = scalar_lea.hbm %s2645_s3, %s1280_s2 }
  0x8c   : > { %s2283_s7 = scalar_lea.sflag [#allocation8], %s2670_s30 }
  0x8d   : > { %s2713_s16 = scalar_select %p2272_p10, 1, 0 }
  0x8e   : > { %p2673_p11 = pneg %p2272_p10 }
  0x90   : > { %s2266_s13 = scalar_lea.hbm %s2712_s1, %s1280_s2  ;;  %s1676_s0 = scalar_lea.hbm %s2712_s1, 1024 }
  0x91   : > { %s1671_s29 = scalar_lea.hbm %s2266_s13, 256  ;;  %p1677_p0 = scmp.lt.u32.totalorder %s2266_s13, %s2712_s1 }
  0x92   : > { %p1672_p1 = scmp.ne.s32.totalorder %s2266_s13, %s1671_s29  ;;  %p1678_p6 = scmp.lt.u32.totalorder %s1676_s0, %s1671_s29 }
  0x93   : > { %p1680_p2 = scmp.lt.u32.totalorder %s1671_s29, %s2266_s13 }
  0x94   : > { %p1674_p12 = pnand %p2673_p11, %p1672_p1  ;;  %p1679_p8 = por %p1678_p6, %p1677_p0 }
  0x96   : > { %p1675_p13 = pneg %p1674_p12  ;;  %p1681_p3 = por %p1680_p2, %p1679_p8 }
  0x98   : > { %p1682_p4 = pnand %p1681_p3, %p1675_p13 }
  0x9a   : > { %1685 = shalt.err (!%p1682_p4)
}
  0x9b   : > { %s1686_s2 = scalar_lea.vmem %s2261_s5, 256  ;;  %s2000_s23 = smov [#allocation7]  }
  0x9c   : > { %p1687_p1 = scmp.ne.s32.totalorder %s2261_s5, %s1686_s2  ;;  %s1691_s28 = sshll.u32 %s2000_s23, 4  ;;  %s1692_s28 = int_to_ptr.vmem [resolvable:$false] %s1691_s28 }
  0x9d   : > { %s1693_s22 = scalar_lea.vmem %s1692_s28, 512  ;;  %p1694_p5 = scmp.lt.s32.totalorder %s2261_s5, %s1692_s28 }
  0x9e   : > { %p1689_p12 = pnand %p1687_p1, %p2673_p11  ;;  %p1695_p0 = scmp.lt.s32.totalorder %s1693_s22, %s1686_s2 }
  0xa0   : > { %p1690_p9 = pneg %p1689_p12  ;;  %p1696_p6 = por %p1695_p0, %p1694_p5 }
  0xa2   : > { %p1697_p2 = pnand %p1696_p6, %p1690_p9 }
  0xa4   : > { %1700 = shalt.err (!%p1697_p2)
}
  0xa5   : > { %s2714_s29 = smov 8   ;;  %s2715_s0 = smov 128  }
  0xa6   : > { %1458 = dma.hbm_to_vmem [thread:$0]  (!%p2272_p10), %s2266_s13, 256, %s2261_s5, %s2283_s7, %s2715_s0, %s2715_s0, %s2714_s29  }
  0xa7   : > { %s441_s9 = scalar_lea.vmem [#allocation10], %s2256_s4  ;;  %s2001_s28 = smov [#allocation15]  }
  0xa8   : > { %s451_s23 = sshll.u32 %s441_s9, 4  ;;  %s335_s2 = sshll.u32 %s2001_s28, 4  ;;  %s2315_s23 = int_to_ptr.vmem [resolvable:$true] %s451_s23  ;;  %s336_s2 = int_to_ptr.vmem [resolvable:$true] %s335_s2 }
  0xa9   : > { %s2716_s6 = sld [smem:[#allocation46_spill]] }
  0xaf   : > { %s1701_s27 = scalar_lea.hbm %s2716_s6, 512 }
  0xb0   : > { %p1702_p5 = scmp.ne.s32.totalorder %s2716_s6, %s1701_s27  ;;  %p1708_p9 = scmp.lt.u32.totalorder %s1701_s27, %s2716_s6 }
  0xb2   : > { %p1704_p3 = pnand %p1702_p5, %p2148_p7 }
  0xb4   : > { %p1705_p4 = pneg %p1704_p3 }
  0xb6   : > { %p1710_p13 = pnand %p1708_p9, %p1705_p4 }
  0xb8   : > { %1713 = shalt.err (!%p1710_p13)
}
  0xb9   : > { %s1714_s4 = scalar_lea.vmem %s336_s2, 512  ;;  %p1722_p0 = scmp.lt.s32.totalorder %s336_s2, %s336_s2 }
  0xba   : > { %p1715_p8 = scmp.ne.s32.totalorder %s336_s2, %s1714_s4  ;;  %p1723_p6 = scmp.lt.s32.totalorder %s1714_s4, %s1714_s4 }
  0xbc   : > { %p1717_p1 = pnand %p1715_p8, %p2148_p7  ;;  %p1724_p2 = por %p1723_p6, %p1722_p0 }
  0xbe   : > { %p1718_p12 = pneg %p1717_p1 }
  0xc0   : > { %p1725_p11 = pnand %p1724_p2, %p1718_p12 }
  0xc2   : > { %1728 = shalt.err (!%p1725_p11)
}
  0xc3   : > { %p2717_p5 = scmp.ne.s32.totalorder %s2701_s24, 0  ;;  %s2002_s15 = smov [#allocation18]  }
  0xc4   : > { %s360_s13 = sshll.u32 %s2002_s15, 4  ;;  %s2718_s8 = sld [smem:[#allocation48_spill]]  ;;  %s361_s13 = int_to_ptr.vmem [resolvable:$true] %s360_s13 }
  0xc5   : > { %1445 = dma.hbm_to_vmem [thread:$0]  (!%p2717_p5), %s2716_s6, 512, %s336_s2, [#allocation14], %s2715_s0, %s2715_s0, %s2714_s29  }
  0xca   : > { %s1729_s9 = scalar_lea.hbm %s2718_s8, 16 }
  0xcb   : > { %p1730_p11 = scmp.ne.s32.totalorder %s2718_s8, %s1729_s9  ;;  %p1736_p9 = scmp.lt.u32.totalorder %s1729_s9, %s2718_s8 }
  0xcd   : > { %p1732_p3 = pnand %p1730_p11, %p2148_p7 }
  0xcf   : > { %p1733_p4 = pneg %p1732_p3 }
  0xd1   : > { %p1738_p13 = pnand %p1736_p9, %p1733_p4 }
  0xd3   : > { %1741 = shalt.err (!%p1738_p13)
}
  0xd4   : > { %s1742_s2 = scalar_lea.vmem %s361_s13, 16  ;;  %s1749_s1 = scalar_lea.vmem %s361_s13, 32 }
  0xd5   : > { %p1743_p8 = scmp.ne.s32.totalorder %s361_s13, %s1742_s2  ;;  %p1750_p0 = scmp.lt.s32.totalorder %s361_s13, %s361_s13 }
  0xd6   : > { %p1751_p6 = scmp.lt.s32.totalorder %s1749_s1, %s1742_s2 }
  0xd7   : > { %p1745_p1 = pnand %p1743_p8, %p2148_p7 }
  0xd8   : > { %p1752_p2 = por %p1751_p6, %p1750_p0 }
  0xd9   : > { %p1746_p12 = pneg %p1745_p1 }
  0xdb   : > { %p1753_p10 = pnand %p1752_p2, %p1746_p12 }
  0xdd   : > { %1756 = shalt.err (!%p1753_p10)
}
  0xde   : > { %s2719_s27 = sld [smem:[#allocation30_spill]]  ;;  %s1265_s30 = sadd.s32 4294967294, %s1993_s19  }
  0xdf   : > { %s2720_s21 = sld [smem:[#allocation29_spill]]  ;;  %s54_s24 = sadd.s32 1, %s1973_s14 }
  0xe0   : > { %1451 = dma.hbm_to_vmem [thread:$0]  (!%p2717_p5), %s2718_s8, 16, %s361_s13, [#allocation17]  }
  0xe1   : > { %p2721_p7 = scmp.eq.s32.totalorder %s2241_s26, 0  ;;  %p286_p3 = scmp.eq.s32.totalorder %s2117_s20, 3 }
  0xe2   : > { %p292_p4 = scmp.eq.s32.totalorder %s1265_s30, 3  ;;  %p2723_p9 = scmp.eq.s32.totalorder %s1993_s19, 0 }
  0xe3   : > { %s2361_s9 = scalar_select %p2721_p7, %s1973_s14, %s54_s24  }
  0xe4   : > { %p61_p10 = scmp.ne.s32.totalorder %s1973_s14, %s2719_s27  ;;  %p2725_p8 = scmp.eq.s32.totalorder %s2117_s20, 0 }
  0xe5   : > { %2722 = sst [smem:[#allocation40_spill]] %s2361_s9  ;;  %p67_p11 = scmp.ne.s32.totalorder %s2719_s27, %s2720_s21 }
  0xe6   : > { %p2370_p13 = por %p2723_p9, %p61_p10  ;;  %p2380_p5 = por %p286_p3, %p61_p10 }
  0xe7   : > { %p2376_p1 = por %p2725_p8, %p67_p11  ;;  %p2384_p12 = por %p292_p4, %p67_p11 }
  0xe8   : > { %s2727_s26 = scalar_select %p2380_p5, 1, 0 }
  0xe9   : > { %s2726_s13 = scalar_select %p2376_p1, 1, 0 }
  0xea   : > { %s2728_s22 = scalar_select %p2384_p12, 1, 0 }
  0xeb   : > { %s2389_s5 = sand.u32 1, %s1973_s14   ;;  %s1275_s4 = sshll.u32 %s1985_s17, 2 }
  0xec   : > { %s1273_s2 = sshll.u32 %s2389_s5, 4  ;;  %s2729_s1 = sshll.u32 %s1989_s18, 1 }
  0xed   : > { %s381_s11 = sadd.s32 %s1275_s4, %s2729_s1  ;;  %s375_s27 = scalar_lea.vmem [#allocation4], %s1273_s2 }
  0xee   : > { %s1276_s15 = sshll.u32 %s381_s11, 7  ;;  %s384_s21 = sshll.u32 %s375_s27, 4  ;;  %s2400_s21 = int_to_ptr.vmem [resolvable:$true] %s384_s21 }
  0xef   : > { %s2730_s6 = sld [smem:[#allocation41_spill]]  ;;  %p2731_p0 = scmp.lt.s32.totalorder %s1993_s19, 4 }
  0xf0   : > { %s1281_s4 = sshll.u32 %s1985_s17, 1  ;;  %s421_s2 = scalar_lea.vmem [#allocation9], %s2389_s5 }
  0xf1   : > { %p2406_p6 = pnand %p2731_p0, %p2370_p13  ;;  %s2412_s1 = sshll.u32 %s421_s2, 4  ;;  %s431_s1 = int_to_ptr.vmem [resolvable:$true] %s2412_s1 }
  0xf2   : > { %s2415_s11 = sadd.s32 %s1989_s18, %s1281_s4 }
  0xf3   : > { %p1759_p7 = pneg %p2406_p6 }
  0xf5   : > { %s2398_s8 = scalar_lea.hbm %s2730_s6, %s1276_s15  ;;  %s372_s15 = scalar_lea.sflag [#allocation5], %s2389_s5 }
  0xf6   : > { %s1757_s27 = scalar_lea.hbm %s2398_s8, 256  ;;  %s1762_s24 = scalar_lea.hbm %s2730_s6, 1024 }
  0xf7   : > { %p1758_p2 = scmp.ne.s32.totalorder %s2398_s8, %s1757_s27  ;;  %p1763_p3 = scmp.lt.u32.totalorder %s2398_s8, %s2730_s6 }
  0xf8   : > { %p1764_p4 = scmp.lt.u32.totalorder %s1762_s24, %s1757_s27  ;;  %p1766_p13 = scmp.lt.u32.totalorder %s1757_s27, %s2398_s8 }
  0xf9   : > { %p1760_p10 = pnand %p1759_p7, %p1758_p2 }
  0xfa   : > { %p1765_p9 = por %p1764_p4, %p1763_p3 }
  0xfb   : > { %p1761_p11 = pneg %p1760_p10 }
  0xfc   : > { %p1767_p8 = por %p1766_p13, %p1765_p9 }
  0xfe   : > { %p1768_p0 = pnand %p1767_p8, %p1761_p11 }
 0x100   : > { %1771 = shalt.err (!%p1768_p0)
}
 0x101   : > { %s1772_s4 = scalar_lea.vmem %s2400_s21, 256  ;;  %s2003_s2 = smov [#allocation4]  }
 0x102   : > { %p1773_p2 = scmp.ne.s32.totalorder %s2400_s21, %s1772_s4  ;;  %s1777_s28 = sshll.u32 %s2003_s2, 4  ;;  %s1778_s28 = int_to_ptr.vmem [resolvable:$false] %s1777_s28 }
 0x103   : > { %s1779_s14 = scalar_lea.vmem %s1778_s28, 512  ;;  %p1780_p5 = scmp.lt.s32.totalorder %s2400_s21, %s1778_s28 }
 0x104   : > { %p1775_p10 = pnand %p1773_p2, %p1759_p7  ;;  %p1781_p3 = scmp.lt.s32.totalorder %s1779_s14, %s1772_s4 }
 0x106   : > { %p1776_p12 = pneg %p1775_p10  ;;  %p1782_p4 = por %p1781_p3, %p1780_p5 }
 0x108   : > { %p1783_p9 = pnand %p1782_p4, %p1776_p12 }
 0x10a   : > { %1786 = shalt.err (!%p1783_p9)
}
 0x10b   : > { %1455 = dma.hbm_to_vmem [thread:$0]  (!%p2406_p6), %s2398_s8, 256, %s2400_s21, %s372_s15, %s2715_s0, %s2715_s0, %s2714_s29  }
 0x10c   : > { %s1282_s17 = sshll.u32 %s2415_s11, 4  ;;  %s2733_s24 = sld [smem:[#allocation43_spill]] }
 0x112   : > { %s428_s4 = scalar_lea.hbm %s2733_s24, %s1282_s17  ;;  %s1792_s14 = scalar_lea.hbm %s2733_s24, 64 }
 0x113   : > { %s1787_s2 = scalar_lea.hbm %s428_s4, 16  ;;  %p1793_p13 = scmp.lt.u32.totalorder %s428_s4, %s2733_s24 }
 0x114   : > { %p1788_p5 = scmp.ne.s32.totalorder %s428_s4, %s1787_s2  ;;  %p1794_p8 = scmp.lt.u32.totalorder %s1792_s14, %s1787_s2 }
 0x115   : > { %p1796_p2 = scmp.lt.u32.totalorder %s1787_s2, %s428_s4 }
 0x116   : > { %p1790_p12 = pnand %p1788_p5, %p1759_p7  ;;  %p1795_p0 = por %p1794_p8, %p1793_p13 }
 0x118   : > { %p1791_p11 = pneg %p1790_p12  ;;  %p1797_p10 = por %p1796_p2, %p1795_p0 }
 0x11a   : > { %p1798_p3 = pnand %p1797_p10, %p1791_p11 }
 0x11c   : > { %1801 = shalt.err (!%p1798_p3)
}
 0x11d   : > { %s1802_s8 = scalar_lea.vmem %s431_s1, 16  ;;  %s2004_s21 = smov [#allocation9]  }
 0x11e   : > { %p1803_p4 = scmp.ne.s32.totalorder %s431_s1, %s1802_s8  ;;  %s1807_s11 = sshll.u32 %s2004_s21, 4  ;;  %s1808_s11 = int_to_ptr.vmem [resolvable:$false] %s1807_s11 }
 0x11f   : > { %s1809_s15 = scalar_lea.vmem %s1808_s11, 32  ;;  %p1810_p12 = scmp.lt.s32.totalorder %s431_s1, %s1808_s11 }
 0x120   : > { %p1805_p9 = pnand %p1803_p4, %p1759_p7  ;;  %p1811_p1 = scmp.lt.s32.totalorder %s1809_s15, %s1802_s8 }
 0x122   : > { %p1806_p5 = pneg %p1805_p9  ;;  %p1812_p8 = por %p1811_p1, %p1810_p12 }
 0x124   : > { %p1813_p13 = pnand %p1812_p8, %p1806_p5 }
 0x126   : > { %1816 = shalt.err (!%p1813_p13)
}
 0x127   : > { %1461 = dma.hbm_to_vmem [thread:$0]  (!%p2406_p6), %s428_s4, 16, %s431_s1, %s2283_s7  }
 0x128   : > { %s2734_s6 = sand.u32 1, %s1993_s19   ;;  %s1817_s17 = scalar_lea.hbm %s2279_s25, 256 }
 0x129   : > { %s2470_s18 = scalar_lea.sflag [#allocation11], %s2734_s6  ;;  %p1818_p7 = scmp.ne.s32.totalorder %s2279_s25, %s1817_s17 }
 0x12a   : > { %p2735_p11 = scmp.ne.s32.totalorder %s2713_s16, 0  ;;  %s1822_s9 = scalar_lea.hbm %s2645_s3, 1024 }
 0x12b   : > { %p1823_p10 = scmp.lt.u32.totalorder %s2279_s25, %s2645_s3  ;;  %p1824_p3 = scmp.lt.u32.totalorder %s1822_s9, %s1817_s17 }
 0x12c   : > { %p2736_p0 = pneg %p2735_p11  ;;  %p1826_p6 = scmp.lt.u32.totalorder %s1817_s17, %s2279_s25 }
 0x12d   : > { %p1825_p4 = por %p1824_p3, %p1823_p10 }
 0x12e   : > { %p1820_p1 = pnand %p1818_p7, %p2736_p0 }
 0x12f   : > { %p1827_p9 = por %p1826_p6, %p1825_p4 }
 0x130   : > { %p1821_p2 = pneg %p1820_p1 }
 0x132   : > { %p1828_p5 = pnand %p1827_p9, %p1821_p2 }
 0x134   : > { %1831 = shalt.err (!%p1828_p5)
}
 0x135   : > { %s1832_s7 = scalar_lea.vmem %s2315_s23, 256  ;;  %p2737_p8 = pmov %p2736_p0 }
 0x136   : > { %p1833_p12 = scmp.ne.s32.totalorder %s2315_s23, %s1832_s7  ;;  %s2005_s1 = smov [#allocation10]  }
 0x137   : > { %s1837_s4 = sshll.u32 %s2005_s1, 4  ;;  %s1838_s4 = int_to_ptr.vmem [resolvable:$false] %s1837_s4 }
 0x138   : > { %p1835_p13 = pnand %p1833_p12, %p2737_p8  ;;  %s1839_s5 = scalar_lea.vmem %s1838_s4, 512 }
 0x139   : > { %p1840_p0 = scmp.lt.s32.totalorder %s2315_s23, %s1838_s4  ;;  %p1841_p1 = scmp.lt.s32.totalorder %s1839_s5, %s1832_s7 }
 0x13a   : > { %p1836_p7 = pneg %p1835_p13 }
 0x13b   : > { %p1842_p10 = por %p1841_p1, %p1840_p0 }
 0x13d   : > { %p1843_p3 = pnand %p1842_p10, %p1836_p7 }
 0x13f   : > { %1846 = shalt.err (!%p1843_p3)
}
 0x140   : > { %1464 = dma.hbm_to_vmem [thread:$0]  (!%p2735_p11), %s2279_s25, 256, %s2315_s23, %s2470_s18, %s2715_s0, %s2715_s0, %s2714_s29  }
 0x141   : > { %s2738_s14 = sld [smem:[#allocation36_spill]] }
 0x147   : > { %p2739_p2 = scmp.ne.s32.totalorder %s2738_s14, 0 }
 0x148   : > { %s2740_s8 = sld [smem:[#allocation30_spill]] (!%p2739_p2)  ;;  %p2741_p4 = scmp.ne.s32.totalorder (!%p2739_p2), %s2726_s13, 0 }
 0x149   : > { %463 = sbr.rel (%p2739_p2) target bundleno = 1304 (0x518), region = 56 }
 0x14e   : > { %s2502_s21 = sand.u32 (!%p2739_p2), 1, %s2740_s8  }
 0x14f   : > { %s1288_s11 = sshll.u32 (!%p2739_p2), %s2502_s21, 4  ;;  %s466_s15 = scalar_lea.sflag (!%p2739_p2), [#allocation5], %s2502_s21 }
 0x150   : > { %s2506_s6 = scalar_lea.vmem [#allocation4], %s1288_s11 }
 0x151   : > { %1920 = dma.done.wait (%p2741_p4), %s466_s15, 256  }
 0x152   : > { %1922 = vsyncadd (%p2741_p4), %s466_s15, 4294967040  ;;  %s474_s16 = sand.u32 1, %s2117_s20   ;;  %s476_s25 = sand.u32 1, %s1957_s10  }
 0x153   : > { %s2514_s29 = sshll.u32 %s476_s25, 4  ;;  %s475_s0 = scalar_lea.sflag [#allocation8], %s474_s16 }
 0x154   : > { %s478_s23 = scalar_lea.vmem [#allocation7], %s2514_s29  ;;  %p2742_p11 = scmp.ne.s32.totalorder %s2710_s12, 0 }
 0x156   : > { %1924 = dma.done.wait (%p2742_p11), %s475_s0, 256  }
 0x157   : > { %1926 = vsyncadd (%p2742_p11), %s475_s0, 4294967040  ;;  %s486_s18 = scalar_lea.vmem [#allocation9], %s2502_s21 }
 0x158   : > { %1928 = dma.done.wait (%p2741_p4), %s475_s0, 16  }
 0x159   : > { %1930 = vsyncadd (%p2741_p4), %s475_s0, 4294967280  ;;  %s492_s17 = scalar_lea.sflag [#allocation11], %s474_s16  ;;  %s495_s27 = scalar_lea.vmem [#allocation10], %s2514_s29 }
 0x15a   : > { %1932 = dma.done.wait (%p2742_p11), %s492_s17, 256  }
 0x15b   : > { %1934 = vsyncadd (%p2742_p11), %s492_s17, 4294967040  ;;  %p2743_p6 = scmp.eq.s32.totalorder %s2117_s20, 0 }
 0x15d   : > { %1936 = dma.done.wait (%p2743_p6), [#allocation11], 512   ;;  %p2744_p9 = pmov %p2743_p6 }
 0x15e   : > { %p2745_p5 = pmov %p2743_p6 }
 0x15f   : > { %1938 = vsyncadd (%p2744_p9), [#allocation11], 4294966784 }
 0x160   : > { %1940 = dma.done.wait (%p2745_p5), [#allocation14], 528   ;;  %p2746_p12 = pmov %p2745_p5 }
 0x161   : > { %p2747_p8 = pmov %p2745_p5 }
 0x162   : > { %1942 = vsyncadd (%p2746_p12), [#allocation14], 4294966768 }
 0x163   : > { %1944 = dma.done.wait (%p2747_p8), [#allocation17], 32   ;;  %p2748_p13 = pmov %p2745_p5 }
 0x164   : > { %v2006_v0 = vmov 0   ;;  %vm583_vm0 = vcmask 261120   ;;  %v667_v1 = vld [vmem:[#allocation15] sm:$0xff]  ;;  %v668_v2 = vld [vmem:[#allocation15 + $0x8] sm:$0xff]  ;;  %v669_v3 = vld [vmem:[#allocation15 + $0x10] sm:$0xff]  ;;  %vm770_vm1 = vcmask 523264  }
 0x165   : > { %1946 = vsyncadd (%p2748_p13), [#allocation17], 4294967264  ;;  %1580 = vset.pattern.permute.xlu0 %v2006_v0  ;;  %v1386_v4 = vpack.c.bf16 %v668_v2, %v667_v1  ;;  %v670_v5 = vld [vmem:[#allocation15 + $0x18] sm:$0xff]  ;;  %v573_v9 = vld [vmem:[#allocation12 + $0x8] sm:$0xff]  ;;  %v2007_v43 = vmov 0.0|0.0   ;;  %vm2008_vm3 = vmmov 0  }
 0x166   : > { %v567_v6 = vld [vmem:[%s478_s23] sm:$0xff]  ;;  %v1390_v7 = vpack.c.bf16 %v670_v5, %v669_v3  ;;  %v571_v16 = vld [vmem:[%s495_s27 + $0x8] sm:$0xff]  ;;  %vm1395_vm2 = vmpackc.low %vm770_vm1, %vm770_vm1  ;;  %v2009_v44 = vmov 0.0   ;;  %vm878_vm4 = vcmask 130048   ;;  %vm787_vm5 = vcmask 1040384   ;;  %s2749_s20 = sld [smem:[#allocation33_spill]] }
 0x167   : > { %1354 = vmatprep.mubr.msk.f32.mxu1 %vm583_vm0, %v567_v6  ;;  %v572_v8 = vld [vmem:[#allocation12] sm:$0xff]  ;;  %v574_v10 = vld [vmem:[#allocation12 + $0x10] sm:$0xff]  ;;  %1387 = vmatprep.subr.bf16.mxu1 %v1386_v4  ;;  %v575_v12 = vld [vmem:[#allocation12 + $0x18] sm:$0xff]  ;;  %s2750_s12 = sld [smem:[#allocation32_spill]]  ;;  %s562_s2 = scalar_lea.vmem [#allocation19], %s2502_s21  ;;  %vm1047_vm6 = vcmask 516096  }
 0x168   : > { %v1378_v11 = vpack.c.bf16 %v573_v9, %v572_v8  ;;  %v565_v13 = vld [vmem:[%s2506_s6] sm:$0xff]  ;;  %1389 = vmatpush3.bf16.msra.mxu1 %v1386_v4  ;;  %v1382_v14 = vpack.c.bf16 %v575_v12, %v574_v10  ;;  %v568_v17 = vld [vmem:[%s478_s23 + $0x8] sm:$0xff]  ;;  %s1064_s28 = sshll.u32 %s562_s2, 4  ;;  %s2751_s4 = sld [smem:[#allocation49_spill]]  ;;  %s2581_s28 = int_to_ptr.vmem [resolvable:$true] %s1064_s28 }
 0x169   : > { %1343 = vmatprep.mubr.msk.f32.mxu0 %vm583_vm0, %v565_v13  ;;  %v570_v15 = vld [vmem:[%s495_s27] sm:$0xff]  ;;  %1391 = vmatprep.subr.bf16.mxu1 %v1390_v7  ;;  %v569_v62 = vld [vmem:[%s486_s18] sm:$0x1]  ;;  %s1050_s14 = scalar_lea.sflag [#allocation6], %s2502_s21  ;;  %s1847_s8 = scalar_lea.vmem %s2581_s28, 16 }
 0x16a   : > { %1379 = vmatprep.subr.bf16.mxu0 %v1378_v11  ;;  %775 = vperm.xlu0 %1580, %v570_v15   ;;  %v566_v18 = vld [vmem:[%s2506_s6 + $0x8] sm:$0xff]  ;;  %v1299_v20 = vld [vmem:[#allocation16] ss:$0 sm:$0xff]  ;;  %v1296_v24 = vld [vmem:[#allocation13] ss:$0 sm:$0xff]  ;;  %v788_v2 = vsel %vm787_vm5, %v569_v62, 1.0  ;;  %p1848_p7 = scmp.ne.s32.totalorder %s2581_s28, %s1847_s8 }
 0x16b   : > { %1381 = vmatpush3.bf16.msra.mxu0 %v1378_v11  ;;  %v1302_v33 = vld [vmem:[#allocation18] ss:$0 sm:$0xff]  ;;  %p2752_p0 = scmp.ne.s32.totalorder %s2727_s26, 0  ;;  %s2010_s11 = smov [#allocation19]  }
 0x16c   : > { %1383 = vmatprep.subr.bf16.mxu0 %v1382_v14  ;;  %1393 = vmatpush3.bf16.msra.mxu1 %v1390_v7  ;;  %s1309_s13 = sshll.u32 %s2749_s20, 1  ;;  %s1851_s15 = sshll.u32 %s2010_s11, 4  ;;  %s1852_s15 = int_to_ptr.vmem [resolvable:$false] %s1851_s15 }
 0x16d   : > { %1400 = vmatprep.subr.bf16.mxu1 %v2007_v43  ;;  %s1060_s30 = sadd.s32 %s2750_s12, %s1309_s13  ;;  %p1849_p1 = pnand %p1848_p7, %p2752_p0 }
 0x16e   : > { %780 = vperm.xlu0 %1580, %v571_v16   ;;  %s1310_s9 = sshll.u32 %s1060_s30, 4  ;;  %s1853_s6 = scalar_lea.vmem %s1852_s15, 32 }
 0x16f   : > { %1385 = vmatpush3.bf16.msra.mxu0 %v1382_v14  ;;  %1355 = vmatmul.mubr.msk.f32.vlgmr.msra.gmra.mrb[0].mxu1 %vm583_vm0, %v568_v17  ;;  %s2579_s5 = scalar_lea.hbm %s2751_s4, %s1310_s9  ;;  %p1850_p10 = pneg %p1849_p1 }
 0x170   : > { %1368 = vmatprep.mubr.msk.f32.mxu1 %vm2008_vm3, %v2009_v44  ;;  %p1854_p3 = scmp.lt.s32.totalorder %s2581_s28, %s1852_s15  ;;  %p1855_p2 = scmp.lt.s32.totalorder %s1853_s6, %s1847_s8 }
 0x172   : > { %1344 = vmatmul.mubr.msk.f32.vlgmr.msra.gmra.mrb[0].mxu0 %vm583_vm0, %v566_v18  ;;  %p1856_p4 = por %p1855_p2, %p1854_p3 }
 0x174   : > { %p1857_p11 = pnand %p1856_p4, %p1850_p10 }
 0x1e9   : > { %v776_v19 = vpop.permute.xlu0 %775 }
 0x1ed   : > { %v781_v26 = vpop.permute.xlu0 %780 }
 0x242   : > { %v1356_v21 = vpop.f32.mrb[0].mxu1 }
 0x243   : > { %v756_v22 = vadd.f32 %v1356_v21, %v1299_v20  ;;  %v750_v23 = vpop.f32.mrb[1].mxu1 }
 0x244   : > { %v751_v25 = vadd.f32 %v1299_v20, %v750_v23 }
 0x245   : > { %v1345_v27 = vpop.f32.mrb[0].mxu0  ;;  %v760_v28 = vmax.f32 %v756_v22, 0.0 }
 0x246   : > { %v656_v29 = vpop.f32.mrb[1].mxu0  ;;  %v759_v30 = vmax.f32 %v751_v25, 0.0  ;;  %v662_v39 = vadd.f32 %v1345_v27, %v1296_v24 }
 0x247   : > { %v657_v31 = vadd.f32 %v1296_v24, %v656_v29  ;;  %772 = vst.msk [vmem:[#allocation2 + $0x8] sm:$0xff] %vm770_vm1, %v760_v28  ;;  %v784_v32 = vmul.f32 %v781_v26, %v760_v28 }
 0x248   : > { %771 = vst.msk [vmem:[#allocation2] sm:$0xff] %vm770_vm1, %v759_v30  ;;  %v783_v34 = vmul.f32 %v776_v19, %v759_v30  ;;  %v666_v41 = vmax.f32 %v662_v39, 0.0 }
 0x249   : > { %v665_v35 = vmax.f32 %v657_v31, 0.0  ;;  %786 = vst.msk [vmem:[#allocation3 + $0x8] sm:$0xff] %vm770_vm1, %v784_v32 }
 0x24a   : > { %785 = vst.msk [vmem:[#allocation3] sm:$0xff] %vm770_vm1, %v783_v34  ;;  %v769_v42 = vmul.f32 %v1302_v33, %v666_v41 }
 0x24b   : > { %v768_v36 = vmul.f32 %v1302_v33, %v665_v35 }
 0x24d   : > { %1361 = vmatprep.mubr.msk.f32.mxu0 %vm770_vm1, %v768_v36 }
 0x24e   : > { %v790_v37 = vld [vmem:[#allocation2 + $0x8] sm:$0xff] }
 0x24f   : > { %v789_v38 = vld [vmem:[#allocation2] sm:$0xff] }
 0x250   : > { %v1394_v40 = vpack.c.bf16 %v790_v37, %v789_v38  ;;  %v973_v1 = vld [vmem:[#allocation3 + $0x8] sm:$0xff] }
 0x251   : > { %v972_v0 = vld [vmem:[#allocation3] sm:$0xff] }
 0x252   : > { %1396 = vmatprep.subr.msk.bf16.mxu0 %vm1395_vm2, %v1394_v40  ;;  %v1404_v3 = vpack.c.bf16 %v973_v1, %v972_v0 }
 0x253   : > { %1399 = vmatpush3.bf16.xpose.msk.msra.mxu0 %vm1395_vm2, %v1394_v40 }
 0x25a   : > { %1362 = vmatmul.mubr.msk.f32.vlgmr.msra.gmra.mrb[2].mxu0 %vm770_vm1, %v769_v42 }
 0x32d   : > { %v1363_v45 = vpop.f32.mrb[2].mxu0 }
 0x32e   : > { %v880_v46 = vsel %vm878_vm4, %v1363_v45, -inf  ;;  %v869_v47 = vpop.f32.mrb[3].mxu0 }
 0x32f   : > { %v879_v48 = vsel %vm878_vm4, %v869_v47, -inf }
 0x330   : > { %v881_v49 = vmax.f32 %v879_v48, %v880_v46 }
 0x332   : > { %v882_v50 = vrot.slane %v881_v49, 4 }
 0x334   : > { %v883_v51 = vmax.f32 %v881_v49, %v882_v50 }
 0x336   : > { %v884_v52 = vrot.slane %v883_v51, 2 }
 0x338   : > { %v885_v53 = vmax.f32 %v883_v51, %v884_v52 }
 0x33a   : > { %v886_v54 = vrot.slane %v885_v53, 1 }
 0x33c   : > { %v887_v55 = vmax.f32 %v885_v53, %v886_v54 }
 0x33e   : > { %v888_v56 = vsub.f32 %v869_v47, %v887_v55  ;;  %v889_v57 = vsub.f32 %v1363_v45, %v887_v55 }
 0x340   : > { %v890_v58 = vmul.f32 1.442695, %v888_v56  ;;  %v892_v59 = vmul.f32 1.442695, %v889_v57 }
 0x342   : > { %1581 = vpow2.f32 %v890_v58 }
 0x343   : > { %1583 = vpow2.f32 %v892_v59 }
 0x34c   : > { %v1582_v60 = vpop.eup %1581 }
 0x34d   : > { %v1584_v61 = vpop.eup %1583 }
 0x34e   : > { %v1401_v63 = vpack.c.bf16 %v1584_v61, %v1582_v60 }
 0x350   : > { %1402 = vmatpush3.bf16.msra.mxu1 %v1401_v63 }
 0x351   : > { %1403 = vmatprep.subr.bf16.mxu1 %v2007_v43 }
 0x353   : > { %1369 = vmatmul.mubr.msk.f32.vlgmr.msra.gmra.mrb[2].mxu1 %vm878_vm4, %v788_v2 }
 0x354   : > { %1405 = vmatpush3.bf16.msra.mxu1 %v1404_v3  ;;  %1375 = vmatprep.mubr.msk.f32.mxu1 %vm2008_vm3, %v2009_v44 }
 0x426   : > { %v963_v4 = vpop.f32.mrb[2].mxu1 }
 0x427   : > { %1585 = vrcp.f32 %v963_v4  ;;  %v1370_v5 = vpop.f32.mrb[3].mxu1 }
 0x431   : > { %v1586_v6 = vpop.eup %1585 }
 0x432   : > { %v969_v7 = vrot.slane %v1586_v6, 1 }
 0x434   : > { %v971_v8 = vmul.f32 %v969_v7, %v963_v4 }
 0x436   : > { %1376 = vmatmul.mubr.msk.f32.vlgmr.msra.gmra.mrb[4].mxu1 %vm878_vm4, %v971_v8 }
 0x509   : > { %v1043_v9 = vpop.f32.mrb[4].mxu1 }
 0x50a   : > { %1048 = vst.msk [vmem:[%s562_s2] sm:$0x1] %vm1047_vm6, %v1043_v9  ;;  %v1377_v10 = vpop.f32.mrb[5].mxu1 }
 0x50b   : > { %1860 = shalt.err (!%p1857_p11)
}
 0x50c   : > { %s1861_s21 = scalar_lea.hbm %s2579_s5, 16  ;;  %s1865_s29 = scalar_lea.hbm %s2751_s4, 64 }
 0x50d   : > { %p1862_p6 = scmp.ne.s32.totalorder %s2579_s5, %s1861_s21  ;;  %p1866_p12 = scmp.lt.u32.totalorder %s2579_s5, %s2751_s4 }
 0x50e   : > { %p1867_p8 = scmp.lt.u32.totalorder %s1865_s29, %s1861_s21  ;;  %p1869_p7 = scmp.lt.u32.totalorder %s1861_s21, %s2579_s5 }
 0x50f   : > { %p1863_p9 = pnand %p1862_p6, %p2752_p0 }
 0x510   : > { %p1868_p13 = por %p1867_p8, %p1866_p12 }
 0x511   : > { %p1864_p5 = pneg %p1863_p9 }
 0x512   : > { %p1870_p1 = por %p1869_p7, %p1868_p13 }
 0x514   : > { %p1871_p10 = pnand %p1870_p1, %p1864_p5 }
 0x516   : > { %1874 = shalt.err (!%p1871_p10)
}
 0x517   : > { %1434 = dma.vmem_to_hbm [thread:$0]  (%p2752_p0), %s2581_s28, 16, %s2579_s5, %s1050_s14  }
 0x518 PF: > { %s2753_s18 = sld [smem:[#allocation29_spill]]  ;;  %p1480_p3 = scmp.ge.s32.totalorder %s1993_s19, 2 }
 0x519   : > { %p2754_p2 = scmp.ne.s32.totalorder %s2728_s22, 0 }
 0x51b   : > { %p1466_p4 = pnand %p1480_p3, %p2754_p2 }
 0x51e   : > { %s1076_s17 = sand.u32 1, %s2753_s18  }
 0x51f   : > { %s1077_s27 = scalar_lea.sflag [#allocation6], %s1076_s17 }
 0x520   : > { %1948 = dma.done.wait (!%p1466_p4), %s1077_s27, 16  }
 0x521   : > { %1950 = vsyncadd (!%p1466_p4), %s1077_s27, 4294967280  ;;  %s33_s19 = sadd.s32 1, %s1993_s19   ;;  %s2755_s20 = sld [smem:[#allocation28_spill]] }
 0x522   : > { %p30_p11 = scmp.ge.s32.totalorder %s33_s19, 6   ;;  %s2756_s11 = sld [smem:[#allocation39_spill]] }
 0x523   : > { %s2757_s12 = sld [smem:[#allocation30_spill]]  ;;  %s2758_s13 = sld [smem:[#allocation31_spill]] }
 0x524   : > { %s2759_s14 = sld [smem:[#allocation40_spill]]  ;;  %s2760_s15 = sld [smem:[#allocation34_spill]] }
 0x525   : > { %s2761_s16 = sld [smem:[#allocation35_spill]]  ;;  %s2762_s17 = sld [smem:[#allocation37_spill]] }
 0x526   : > { %s2763_s18 = sld [smem:[#allocation38_spill]]  ;;  %s2764_s30 = smov %s1957_s10 }
 0x527   : > { %s2765_s10 = smov %s2755_s20  ;;  %32 = sbr.rel (!%p30_p11) target bundleno = 25 (0x19), region = 158 }
 0x52e   :  { %1081 = vsyncpa [#allocation5], 1 }
 0x52f   :  { %1083 = vsyncpa [#allocation5 + $0x1], 1 }
 0x530   :  { %1084 = vsyncpa [#allocation8], 1 }
 0x531   :  { %1086 = vsyncpa [#allocation8 + $0x1], 1 }
 0x532   :  { %1087 = vsyncpa [#allocation11], 1 }
 0x533   :  { %1089 = vsyncpa [#allocation11 + $0x1], 1 }
 0x534   :  { %1090 = vsyncpa [#allocation14], 1 }
 0x535   :  { %1091 = vsyncpa [#allocation17], 1 }
 0x536   :  { %1092 = vsyncpa [#allocation6], 1 }
 0x537   :  { %1094 = vsyncpa [#allocation6 + $0x1], 1 }

</bundles_post_ra>
